<compile_context>
chip_gen: v5e
topology: v5e:2x2
jax: 0.10.0
libtpu: 0.0.40
codegen_flags: <defaults>
</compile_context>

<pallas_src>
import functools
import math

import jax
import jax.numpy as jnp
from jax import lax
from jax.experimental import pallas as pl
from jax.experimental.pallas import tpu as pltpu


def _attn_head_kernel(h_ref, wq_ref, bq_ref, wk_ref, bk_ref, wv_ref, bv_ref,
                      mask_ref, ctx_ref, scores_ref, *, scale):
    """One (batch, head) pair per grid step.

    h_ref:      (1, S, E)     bf16 sampled hidden states for this batch element
    w*_ref:     (1, E, Dh)    bf16 per-head sampled projection weights
    b*_ref:     (1, 1, Dh)    f32 per-head sampled biases
    mask_ref:   (1, 1, 1, S)  f32 additive attention mask
    ctx_ref:    (1, 1, S, Dh) f32 per-head context output
    scores_ref: (1, 1, S, S)  f32 attention scores (post scale + mask, pre-softmax)
    """
    h = h_ref[0]                                   # [S, E]  bf16

    q = jnp.dot(h, wq_ref[0], preferred_element_type=jnp.float32) + bq_ref[0]
    k = jnp.dot(h, wk_ref[0], preferred_element_type=jnp.float32) + bk_ref[0]
    v = jnp.dot(h, wv_ref[0], preferred_element_type=jnp.float32) + bv_ref[0]

    # Fold the 1/sqrt(Dh) scale into q (S*Dh mults instead of S*S).
    qs = (q * scale).astype(jnp.bfloat16)          # [S, Dh]
    kb = k.astype(jnp.bfloat16)                    # [S, Dh]

    # scores[i, j] = sum_d q[i, d] * k[j, d] -- contract Dh directly, no k.T
    # (the MXU consumes a transposed RHS natively via dot_general).
    s = lax.dot_general(qs, kb, (((1,), (1,)), ((), ())),
                        preferred_element_type=jnp.float32)      # [S, S] f32
    s = s + mask_ref[0, 0]                         # additive mask over the key dim
    scores_ref[0, 0] = s

    # Softmax over keys, in f32; reciprocal goes to the otherwise-idle EUP slot.
    m = jnp.max(s, axis=-1, keepdims=True)
    p = jnp.exp(s - m)
    denom = jnp.sum(p, axis=-1, keepdims=True)
    p = p * pl.reciprocal(denom, approx=True)
    # TODO(synk): attention-prob dropout is identity in eval mode; not applied.

    ctx_ref[0, 0] = jnp.dot(p.astype(jnp.bfloat16), v.astype(jnp.bfloat16),
                            preferred_element_type=jnp.float32)  # [S, Dh]


def super_bert_self_attention(hidden_states, attention_mask, params,
                              sample_embed_dim, num_attention_head, qkv_size):
    """Pallas implementation of SuperBertSelfAttention.forward (eval mode).

    Returns (context_layer [B, S, qkv_size], attention_scores [B, H, S, S]).
    """
    assert qkv_size % num_attention_head == 0
    head_size = qkv_size // num_attention_head
    B, S, E = hidden_states.shape
    assert E == sample_embed_dim
    H, Dh = num_attention_head, head_size

    # --- set_sample_config / sample_weight / sample_bias (in_index/out_index=None)
    # plus head-major relayout of the sampled weights: plain-JAX plumbing. ---
    def _sample(w, b):
        w_s = w[:qkv_size, :sample_embed_dim]              # [QKV, E]
        w_h = w_s.reshape(H, Dh, E).transpose(0, 2, 1)     # [H, E, Dh]
        b_h = b[:qkv_size].reshape(H, 1, Dh)               # [H, 1, Dh]
        return w_h.astype(jnp.bfloat16), b_h.astype(jnp.float32)

    wq, bq = _sample(params["wq"], params["bq"])
    wk, bk = _sample(params["wk"], params["bk"])
    wv, bv = _sample(params["wv"], params["bv"])

    h_bf16 = hidden_states.astype(jnp.bfloat16)
    mask = attention_mask.astype(jnp.float32)

    kernel = functools.partial(_attn_head_kernel, scale=1.0 / math.sqrt(head_size))

    weight_spec = pl.BlockSpec((1, E, Dh), lambda b, h: (h, 0, 0))
    bias_spec = pl.BlockSpec((1, 1, Dh), lambda b, h: (h, 0, 0))

    ctx_heads, scores = pl.pallas_call(
        kernel,
        grid=(B, H),
        in_specs=[
            # hidden block index depends only on b, so it stays VMEM-resident
            # across the inner head axis (no redundant DMA).
            pl.BlockSpec((1, S, E), lambda b, h: (b, 0, 0)),
            weight_spec, bias_spec,     # query
            weight_spec, bias_spec,     # key
            weight_spec, bias_spec,     # value
            pl.BlockSpec((1, 1, 1, S), lambda b, h: (b, 0, 0, 0)),
        ],
        out_specs=[
            pl.BlockSpec((1, 1, S, Dh), lambda b, h: (b, h, 0, 0)),
            pl.BlockSpec((1, 1, S, S), lambda b, h: (b, h, 0, 0)),
        ],
        out_shape=[
            jax.ShapeDtypeStruct((B, H, S, Dh), jnp.float32),
            # TODO(synk): scores could be emitted in bf16 (or skipped) when the
            # caller does not need f32 -- they dominate HBM writeback at large S.
            jax.ShapeDtypeStruct((B, H, S, S), jnp.float32),
        ],
        compiler_params=pltpu.CompilerParams(
            dimension_semantics=("parallel", "parallel"),
            vmem_limit_bytes=64 * 1024 * 1024,
        ),
    )(h_bf16, wq, bq, wk, bk, wv, bv, mask)

    # Merge heads: [B, H, S, Dh] -> [B, S, QKV]  (plain-JAX layout plumbing).
    ctx = ctx_heads.transpose(0, 2, 1, 3).reshape(B, S, qkv_size)
    # TODO(synk): for long sequences (e.g. BERT-base S=512) additionally tile the
    # query/key axes; for tiny sampled configs like the demo, padding to
    # (8,128)-aligned shapes or a plain-XLA fallback would be faster still.
    return ctx, scores


def _reference(hidden_states, attention_mask, params,
               sample_embed_dim, num_attention_head, qkv_size):
    """Pure-JAX f32 mirror of the PyTorch forward, for correctness checking."""
    B, S, E = hidden_states.shape
    Dh = qkv_size // num_attention_head

    def lin(w, b):
        w_s = w[:qkv_size, :sample_embed_dim]
        b_s = b[:qkv_size]
        return hidden_states @ w_s.T + b_s

    def to_scores(x):
        return x.reshape(B, S, num_attention_head, Dh).transpose(0, 2, 1, 3)

    q = to_scores(lin(params["wq"], params["bq"]))
    k = to_scores(lin(params["wk"], params["bk"]))
    v = to_scores(lin(params["wv"], params["bv"]))

    scores = jnp.einsum("bhqd,bhkd->bhqk", q, k) / math.sqrt(Dh)
    scores = scores + attention_mask
    probs = jax.nn.softmax(scores, axis=-1)
    ctx = jnp.einsum("bhqk,bhkd->bhqd", probs, v)
    ctx = ctx.transpose(0, 2, 1, 3).reshape(B, S, qkv_size)
    return ctx, scores


if __name__ == "__main__":
    # Super-net config (shapes from SuperBertSelfAttention.__init__):
    #   hidden_size = qkv_size = 32  ->  query/key/value are SuperLinear(32, 32)
    SUPER_HIDDEN = 32
    SUPER_QKV = 32

    # Sampled sub-net config (the args passed to forward):
    B, S = 2, 8
    sample_embed_dim = 24
    num_attention_head = 2
    qkv_size = 16

    key = jax.random.PRNGKey(0)
    k_hs, k_wq, k_wk, k_wv = jax.random.split(key, 4)

    # Deterministic xavier-uniform-like init for the super weights; biases = 0
    # (matches SuperLinear._reset_parameters).
    limit = math.sqrt(6.0 / (SUPER_HIDDEN + SUPER_QKV))
    params = {
        "wq": jax.random.uniform(k_wq, (SUPER_QKV, SUPER_HIDDEN), jnp.float32, -limit, limit),
        "wk": jax.random.uniform(k_wk, (SUPER_QKV, SUPER_HIDDEN), jnp.float32, -limit, limit),
        "wv": jax.random.uniform(k_wv, (SUPER_QKV, SUPER_HIDDEN), jnp.float32, -limit, limit),
        "bq": jnp.zeros((SUPER_QKV,), jnp.float32),
        "bk": jnp.zeros((SUPER_QKV,), jnp.float32),
        "bv": jnp.zeros((SUPER_QKV,), jnp.float32),
    }

    hidden_states = jax.random.normal(k_hs, (B, S, sample_embed_dim), jnp.float32)

    # Standard extended BERT attention mask: valid -> 0, padded -> -10000.
    valid = jnp.array([[1] * S, [1] * 6 + [0] * 2], jnp.float32)  # [B, S]
    attention_mask = (1.0 - valid)[:, None, None, :] * -10000.0   # [B, 1, 1, S]

    ctx, scores = super_bert_self_attention(
        hidden_states, attention_mask, params,
        sample_embed_dim, num_attention_head, qkv_size)
    jax.block_until_ready((ctx, scores))

    ctx_ref, scores_ref = _reference(
        hidden_states, attention_mask, params,
        sample_embed_dim, num_attention_head, qkv_size)

    assert ctx.shape == (B, S, qkv_size)
    assert scores.shape == (B, num_attention_head, S, S)
    # bf16 MXU operands in the kernel -> loosened tolerances vs the f32 reference.
    assert jnp.allclose(scores, scores_ref, atol=5e-2, rtol=1e-3), \
        float(jnp.max(jnp.abs(scores - scores_ref)))
    assert jnp.allclose(ctx, ctx_ref, atol=5e-2, rtol=1e-3), \
        float(jnp.max(jnp.abs(ctx - ctx_ref)))

    print("KERNEL_OK")
</pallas_src>

<mosaic_0001>
module attributes {stable_mosaic.version = 11 : i64} {
  func.func @_attn_head_kernel(%arg0: i32, %arg1: i32, %arg2: memref<1x8x24xbf16, #tpu.memory_space<vmem>>, %arg3: memref<1x24x8xbf16, #tpu.memory_space<vmem>>, %arg4: memref<1x1x8xf32, #tpu.memory_space<vmem>>, %arg5: memref<1x24x8xbf16, #tpu.memory_space<vmem>>, %arg6: memref<1x1x8xf32, #tpu.memory_space<vmem>>, %arg7: memref<1x24x8xbf16, #tpu.memory_space<vmem>>, %arg8: memref<1x1x8xf32, #tpu.memory_space<vmem>>, %arg9: memref<1x1x1x8xf32, #tpu.memory_space<vmem>>, %arg10: memref<1x1x8x8xf32, #tpu.memory_space<vmem>>, %arg11: memref<1x1x8x8xf32, #tpu.memory_space<vmem>>) attributes {dimension_semantics = [#tpu.dimension_semantics<parallel>, #tpu.dimension_semantics<parallel>], iteration_bounds = array<i64: 2, 2>, scalar_prefetch = 0 : i64, scratch_operands = 0 : i64, tpu.core_type = #tpu.core_type<tc>, window_params = [{transform_indices = @transform_0, window_bounds = array<i64: 1, 8, 24>}, {transform_indices = @transform_1, window_bounds = array<i64: 1, 24, 8>}, {transform_indices = @transform_2, window_bounds = array<i64: 1, 1, 8>}, {transform_indices = @transform_3, window_bounds = array<i64: 1, 24, 8>}, {transform_indices = @transform_4, window_bounds = array<i64: 1, 1, 8>}, {transform_indices = @transform_5, window_bounds = array<i64: 1, 24, 8>}, {transform_indices = @transform_6, window_bounds = array<i64: 1, 1, 8>}, {transform_indices = @transform_7, window_bounds = array<i64: 1, 1, 1, 8>}, {transform_indices = @transform_8, window_bounds = array<i64: 1, 1, 8, 8>}, {transform_indices = @transform_9, window_bounds = array<i64: 1, 1, 8, 8>}]} {
    %c0 = arith.constant 0 : index
    %c0_0 = arith.constant 0 : index
    %c0_1 = arith.constant 0 : index
    %0 = vector.load %arg2[%c0, %c0_0, %c0_1] : memref<1x8x24xbf16, #tpu.memory_space<vmem>>, vector<1x8x24xbf16>
    %1 = vector.shape_cast %0 : vector<1x8x24xbf16> to vector<8x24xbf16>
    %c0_2 = arith.constant 0 : index
    %c0_3 = arith.constant 0 : index
    %c0_4 = arith.constant 0 : index
    %2 = vector.load %arg3[%c0_2, %c0_3, %c0_4] : memref<1x24x8xbf16, #tpu.memory_space<vmem>>, vector<1x24x8xbf16>
    %3 = vector.shape_cast %2 : vector<1x24x8xbf16> to vector<24x8xbf16>
    %cst = arith.constant dense<0.000000e+00> : vector<8x8xf32>
    %4 = tpu.matmul %1, %3, %cst {dimension_numbers = #tpu.dot_dimension_numbers<[1], [0], [0], [1], [0, 0, 1, 1], [], []>} : vector<8x24xbf16>, vector<24x8xbf16>, vector<8x8xf32> -> vector<8x8xf32>
    %c0_5 = arith.constant 0 : index
    %c0_6 = arith.constant 0 : index
    %c0_7 = arith.constant 0 : index
    %5 = vector.load %arg4[%c0_5, %c0_6, %c0_7] : memref<1x1x8xf32, #tpu.memory_space<vmem>>, vector<1x1x8xf32>
    %6 = vector.shape_cast %5 : vector<1x1x8xf32> to vector<1x8xf32>
    %7 = vector.broadcast %6 : vector<1x8xf32> to vector<8x8xf32>
    %8 = arith.addf %4, %7 : vector<8x8xf32>
    %c0_8 = arith.constant 0 : index
    %c0_9 = arith.constant 0 : index
    %c0_10 = arith.constant 0 : index
    %9 = vector.load %arg5[%c0_8, %c0_9, %c0_10] : memref<1x24x8xbf16, #tpu.memory_space<vmem>>, vector<1x24x8xbf16>
    %10 = vector.shape_cast %9 : vector<1x24x8xbf16> to vector<24x8xbf16>
    %cst_11 = arith.constant dense<0.000000e+00> : vector<8x8xf32>
    %11 = tpu.matmul %1, %10, %cst_11 {dimension_numbers = #tpu.dot_dimension_numbers<[1], [0], [0], [1], [0, 0, 1, 1], [], []>} : vector<8x24xbf16>, vector<24x8xbf16>, vector<8x8xf32> -> vector<8x8xf32>
    %c0_12 = arith.constant 0 : index
    %c0_13 = arith.constant 0 : index
    %c0_14 = arith.constant 0 : index
    %12 = vector.load %arg6[%c0_12, %c0_13, %c0_14] : memref<1x1x8xf32, #tpu.memory_space<vmem>>, vector<1x1x8xf32>
    %13 = vector.shape_cast %12 : vector<1x1x8xf32> to vector<1x8xf32>
    %14 = vector.broadcast %13 : vector<1x8xf32> to vector<8x8xf32>
    %15 = arith.addf %11, %14 : vector<8x8xf32>
    %c0_15 = arith.constant 0 : index
    %c0_16 = arith.constant 0 : index
    %c0_17 = arith.constant 0 : index
    %16 = vector.load %arg7[%c0_15, %c0_16, %c0_17] : memref<1x24x8xbf16, #tpu.memory_space<vmem>>, vector<1x24x8xbf16>
    %17 = vector.shape_cast %16 : vector<1x24x8xbf16> to vector<24x8xbf16>
    %cst_18 = arith.constant dense<0.000000e+00> : vector<8x8xf32>
    %18 = tpu.matmul %1, %17, %cst_18 {dimension_numbers = #tpu.dot_dimension_numbers<[1], [0], [0], [1], [0, 0, 1, 1], [], []>} : vector<8x24xbf16>, vector<24x8xbf16>, vector<8x8xf32> -> vector<8x8xf32>
    %c0_19 = arith.constant 0 : index
    %c0_20 = arith.constant 0 : index
    %c0_21 = arith.constant 0 : index
    %19 = vector.load %arg8[%c0_19, %c0_20, %c0_21] : memref<1x1x8xf32, #tpu.memory_space<vmem>>, vector<1x1x8xf32>
    %20 = vector.shape_cast %19 : vector<1x1x8xf32> to vector<1x8xf32>
    %21 = vector.broadcast %20 : vector<1x8xf32> to vector<8x8xf32>
    %22 = arith.addf %18, %21 : vector<8x8xf32>
    %cst_22 = arith.constant 0.353553385 : f32
    %23 = vector.broadcast %cst_22 : f32 to vector<8x8xf32>
    %24 = arith.mulf %8, %23 : vector<8x8xf32>
    %25 = arith.truncf %24 : vector<8x8xf32> to vector<8x8xbf16>
    %26 = arith.truncf %15 : vector<8x8xf32> to vector<8x8xbf16>
    %cst_23 = arith.constant dense<0.000000e+00> : vector<8x8xf32>
    %27 = tpu.matmul %25, %26, %cst_23 {dimension_numbers = #tpu.dot_dimension_numbers<[1], [1], [0], [0], [0, 0, 1, 0], [], []>} : vector<8x8xbf16>, vector<8x8xbf16>, vector<8x8xf32> -> vector<8x8xf32>
    %c0_24 = arith.constant 0 : index
    %c0_25 = arith.constant 0 : index
    %c0_26 = arith.constant 0 : index
    %c0_27 = arith.constant 0 : index
    %28 = vector.load %arg9[%c0_24, %c0_25, %c0_26, %c0_27] : memref<1x1x1x8xf32, #tpu.memory_space<vmem>>, vector<1x1x1x8xf32>
    %29 = vector.shape_cast %28 : vector<1x1x1x8xf32> to vector<1x8xf32>
    %30 = vector.broadcast %29 : vector<1x8xf32> to vector<8x8xf32>
    %31 = arith.addf %27, %30 : vector<8x8xf32>
    %c0_28 = arith.constant 0 : index
    %c0_29 = arith.constant 0 : index
    %c0_30 = arith.constant 0 : index
    %c0_31 = arith.constant 0 : index
    %32 = vector.load %arg11[%c0_28, %c0_29, %c0_30, %c0_31] : memref<1x1x8x8xf32, #tpu.memory_space<vmem>>, vector<1x1x8x8xf32>
    %33 = vector.shape_cast %32 : vector<1x1x8x8xf32> to vector<8x8xf32>
    %34 = vector.shape_cast %31 : vector<8x8xf32> to vector<1x1x8x8xf32>
    tpu.vector_store %arg11[%c0_28, %c0_29, %c0_30, %c0_31], %34 {strides = array<i32>} : memref<1x1x8x8xf32, #tpu.memory_space<vmem>>, vector<1x1x8x8xf32>,
    %cst_32 = arith.constant dense<0xFF800000> : vector<8xf32>
    %35 = vector.multi_reduction <maximumf>, %31, %cst_32 [1] : vector<8x8xf32> to vector<8xf32>
    %36 = vector.shape_cast %35 : vector<8xf32> to vector<8x1xf32>
    %37 = vector.broadcast %36 : vector<8x1xf32> to vector<8x8xf32>
    %38 = arith.subf %31, %37 : vector<8x8xf32>
    %39 = math.exp %38 : vector<8x8xf32>
    %cst_33 = arith.constant dense<0.000000e+00> : vector<8xf32>
    %40 = vector.multi_reduction <add>, %39, %cst_33 [1] : vector<8x8xf32> to vector<8xf32>
    %41 = vector.shape_cast %40 : vector<8xf32> to vector<8x1xf32>
    %42 = tpu.reciprocal %41 {approx = true} : vector<8x1xf32> -> vector<8x1xf32>
    %43 = vector.broadcast %42 : vector<8x1xf32> to vector<8x8xf32>
    %44 = arith.mulf %39, %43 : vector<8x8xf32>
    %45 = arith.truncf %44 : vector<8x8xf32> to vector<8x8xbf16>
    %46 = arith.truncf %22 : vector<8x8xf32> to vector<8x8xbf16>
    %cst_34 = arith.constant dense<0.000000e+00> : vector<8x8xf32>
    %47 = tpu.matmul %45, %46, %cst_34 {dimension_numbers = #tpu.dot_dimension_numbers<[1], [0], [0], [1], [0, 0, 1, 1], [], []>} : vector<8x8xbf16>, vector<8x8xbf16>, vector<8x8xf32> -> vector<8x8xf32>
    %c0_35 = arith.constant 0 : index
    %c0_36 = arith.constant 0 : index
    %c0_37 = arith.constant 0 : index
    %c0_38 = arith.constant 0 : index
    %48 = vector.load %arg10[%c0_35, %c0_36, %c0_37, %c0_38] : memref<1x1x8x8xf32, #tpu.memory_space<vmem>>, vector<1x1x8x8xf32>
    %49 = vector.shape_cast %48 : vector<1x1x8x8xf32> to vector<8x8xf32>
    %50 = vector.shape_cast %47 : vector<8x8xf32> to vector<1x1x8x8xf32>
    tpu.vector_store %arg10[%c0_35, %c0_36, %c0_37, %c0_38], %50 {strides = array<i32>} : memref<1x1x8x8xf32, #tpu.memory_space<vmem>>, vector<1x1x8x8xf32>,
    return
  }
  func.func @transform_0(%arg0: i32, %arg1: i32) -> (i32, i32, i32) {
    %c0_i32 = arith.constant 0 : i32
    %c0_i32_0 = arith.constant 0 : i32
    %c0_i32_1 = arith.constant 0 : i32
    return %arg0, %c0_i32, %c0_i32_0 : i32, i32, i32
  }
  func.func @transform_1(%arg0: i32, %arg1: i32) -> (i32, i32, i32) {
    %c0_i32 = arith.constant 0 : i32
    %c0_i32_0 = arith.constant 0 : i32
    %c0_i32_1 = arith.constant 0 : i32
    return %arg1, %c0_i32, %c0_i32_0 : i32, i32, i32
  }
  func.func @transform_2(%arg0: i32, %arg1: i32) -> (i32, i32, i32) {
    %c0_i32 = arith.constant 0 : i32
    %c0_i32_0 = arith.constant 0 : i32
    %c0_i32_1 = arith.constant 0 : i32
    return %arg1, %c0_i32, %c0_i32_0 : i32, i32, i32
  }
  func.func @transform_3(%arg0: i32, %arg1: i32) -> (i32, i32, i32) {
    %c0_i32 = arith.constant 0 : i32
    %c0_i32_0 = arith.constant 0 : i32
    %c0_i32_1 = arith.constant 0 : i32
    return %arg1, %c0_i32, %c0_i32_0 : i32, i32, i32
  }
  func.func @transform_4(%arg0: i32, %arg1: i32) -> (i32, i32, i32) {
    %c0_i32 = arith.constant 0 : i32
    %c0_i32_0 = arith.constant 0 : i32
    %c0_i32_1 = arith.constant 0 : i32
    return %arg1, %c0_i32, %c0_i32_0 : i32, i32, i32
  }
  func.func @transform_5(%arg0: i32, %arg1: i32) -> (i32, i32, i32) {
    %c0_i32 = arith.constant 0 : i32
    %c0_i32_0 = arith.constant 0 : i32
    %c0_i32_1 = arith.constant 0 : i32
    return %arg1, %c0_i32, %c0_i32_0 : i32, i32, i32
  }
  func.func @transform_6(%arg0: i32, %arg1: i32) -> (i32, i32, i32) {
    %c0_i32 = arith.constant 0 : i32
    %c0_i32_0 = arith.constant 0 : i32
    %c0_i32_1 = arith.constant 0 : i32
    return %arg1, %c0_i32, %c0_i32_0 : i32, i32, i32
  }
  func.func @transform_7(%arg0: i32, %arg1: i32) -> (i32, i32, i32, i32) {
    %c0_i32 = arith.constant 0 : i32
    %c0_i32_0 = arith.constant 0 : i32
    %c0_i32_1 = arith.constant 0 : i32
    %c0_i32_2 = arith.constant 0 : i32
    return %arg0, %c0_i32, %c0_i32_0, %c0_i32_1 : i32, i32, i32, i32
  }
  func.func @transform_8(%arg0: i32, %arg1: i32) -> (i32, i32, i32, i32) {
    %c0_i32 = arith.constant 0 : i32
    %c0_i32_0 = arith.constant 0 : i32
    %c0_i32_1 = arith.constant 0 : i32
    return %arg0, %arg1, %c0_i32, %c0_i32_0 : i32, i32, i32, i32
  }
  func.func @transform_9(%arg0: i32, %arg1: i32) -> (i32, i32, i32, i32) {
    %c0_i32 = arith.constant 0 : i32
    %c0_i32_0 = arith.constant 0 : i32
    %c0_i32_1 = arith.constant 0 : i32
    return %arg0, %arg1, %c0_i32, %c0_i32_0 : i32, i32, i32, i32
  }
}

</mosaic_0001>

<bundles_post_ra>
// kernel: tpu_custom_call.1
= control target key start
LH: loop header
LB: loop body
LE: loop exit
PB: predicated region body
PF: predicated region fallthrough
CT: control target
= control target key end

     0   :  { %s1353_s0 = inlined_call_operand.vmem [shape: bf16[2,8,24], index: 0, kind: input, shape index: {}]   ;;  %s1354_s1 = inlined_call_operand.vmem [shape: bf16[2,24,8], index: 1, kind: input, shape index: {}]   ;;  %s1355_s2 = inlined_call_operand.vmem [shape: f32[2,1,8], index: 2, kind: input, shape index: {}]   ;;  %s1356_s3 = inlined_call_operand.vmem [shape: bf16[2,24,8], index: 3, kind: input, shape index: {}]   ;;  %s1357_s4 = inlined_call_operand.vmem [shape: f32[2,1,8], index: 4, kind: input, shape index: {}]   ;;  %s1358_s5 = inlined_call_operand.vmem [shape: bf16[2,24,8], index: 5, kind: input, shape index: {}]   ;;  %s1359_s6 = inlined_call_operand.vmem [shape: f32[2,1,8], index: 6, kind: input, shape index: {}]   ;;  %s1360_s7 = inlined_call_operand.vmem [shape: f32[2,1,1,8], index: 7, kind: input, shape index: {}]   ;;  %s1361_s8 = inlined_call_operand.hbm [shape: f32[2,2,8,8], index: 8, kind: output, shape index: {0}]   ;;  %s1362_s9 = inlined_call_operand.hbm [shape: f32[2,2,8,8], index: 9, kind: output, shape index: {1}]  }
   0x1   :  { %1367 = sst [smem:[#allocation12_spill]] %s1354_s1 }
   0x2   :  { %1368 = sst [smem:[#allocation13_spill]] %s1355_s2 }
   0x3   :  { %1369 = sst [smem:[#allocation14_spill]] %s1356_s3 }
   0x4   :  { %15 = vsyncpa [#allocation3], 0 }
   0x5   :  { %17 = vsyncpa [#allocation3 + $0x1], 0 }
   0x6   :  { %18 = vsyncpa [#allocation5], 0 }
   0x7   :  { %20 = vsyncpa [#allocation5 + $0x1], 0  ;;  %s1155_s30 = smov 0   ;;  %s1157_s10 = smov 0  }
   0x8   :  { %s1159_s11 = smov 0   ;;  %s1161_s12 = smov 0  }
   0x9   :  { %s1163_s13 = smov 0   ;;  %s1165_s14 = smov 0  }
   0xa   :  { %s1167_s15 = smov 0   ;;  %s1169_s16 = smov 0  }
   0xb LB: > { %1370 = sst [smem:[#allocation8_spill]] %s1095_s14  ;;  %s853_s17 = sadd.s32 4294967295, %s1103_s16   ;;  %s1103_s16 = sphi %s1169_s16, %s26_s16   ;;  %s1099_s15 = sphi %s1167_s15, %s1382_s15   ;;  %s1095_s14 = sphi %s1165_s14, %s1381_s14   ;;  %s1091_s13 = sphi %s1163_s13, %s1380_s13   ;;  %s1087_s12 = sphi %s1161_s12, %s1379_s12   ;;  %s1083_s11 = sphi %s1159_s11, %s1385_s11   ;;  %s1079_s10 = sphi %s1157_s10, %s1384_s10   ;;  %s1075_s30 = sphi %s1155_s30, %s1383_s30  }
   0xc   : > { %1371 = sst [smem:[#allocation9_spill]] %s1099_s15  ;;  %s854_s18 = sadd.s32 4294967294, %s1103_s16  }
   0xd   : > { %s35_s19 = sadd.s32 1, %s1095_s14  ;;  %s38_s20 = sadd.s32 1, %s1099_s15 }
   0xe   : > { %p36_p0 = scmp.ge.s32.totalorder %s35_s19, 2  ;;  %p265_p1 = scmp.ne.s32.totalorder %s1083_s11, %s1079_s10 }
   0xf   : > { %p266_p2 = scmp.eq.s32.totalorder %s853_s17, 3  ;;  %p271_p5 = scmp.ne.s32.totalorder %s1079_s10, %s1075_s30 }
  0x10   : > { %s1387_s19 = smov (%p36_p0, %s35_s19), 0  ;;  %s1389_s20 = smov (!%p36_p0, %s38_s20), %s1099_s15 }
  0x11   : > { %1372 = sst [smem:[#allocation10_spill]] %s1387_s19  ;;  %s251_s21 = ssub.s32 %s1095_s14, %s1387_s19 }
  0x12   : > { %p1206_p3 = por %p266_p2, %p265_p1  ;;  %p40_p4 = scmp.ge.s32.totalorder %s1389_s20, 2 }
  0x13   : > { %p272_p6 = scmp.eq.s32.totalorder %s854_s18, 3  ;;  %p857_p7 = scmp.ge.s32.totalorder %s1103_s16, 1 }
  0x14   : > { %s1391_s20 = smov (%p40_p4, %s1389_s20), 0  ;;  %p373_p9 = scmp.lt.s32.totalorder %s1103_s16, 5 }
  0x15   : > { %1374 = sst [smem:[#allocation11_spill]] %s1391_s20  ;;  %p1215_p8 = por %p272_p6, %p271_p5 }
  0x16   : > { %s250_s24 = ssub.s32 %s1099_s15, %s1391_s20  ;;  %s255_s25 = sadd.s32 1, %s1083_s11 }
  0x17   : > { %s252_s26 = sor.u32 %s251_s21, %s250_s24  ;;  %p374_p10 = pnand %p857_p7, %p373_p9 }
  0x18   : > { %p253_p11 = scmp.eq.s32.totalorder %s252_s26, 0  ;;  %p444_p12 = scmp.lt.s32.totalorder (!%p374_p10), %s1087_s12, 1 }
  0x19   : > { %377 = sbr.rel (%p374_p10) target bundleno = 711 (0x2c7), region = 52  ;;  %p440_p13 = scmp.lt.s32.totalorder (!%p374_p10), %s1091_s13, 1 }
  0x1a   : > { %s1224_s27 = scalar_select %p253_p11, %s1083_s11, %s255_s25  }
  0x1b   : > { %s1376_s2 = sld [smem:[#allocation13_spill]] (!%p374_p10) }
  0x1c   : > { %s1377_s1 = sld [smem:[#allocation12_spill]] (!%p374_p10) }
  0x1d   : > { %s1378_s3 = sld [smem:[#allocation14_spill]] (!%p374_p10) }
  0x1e   : > { %s1228_s28 = scalar_select %p444_p12, %s1087_s12, 1  ;;  %vm493_vm0 = vcmask 1043456   ;;  %vm489_vm1 = vcmask 195584   ;;  %vm581_vm2 = vcmask 64512  }
  0x1f   : > { %s1247_s14 = scalar_select %p440_p13, %s1091_s13, 1 }
  0x20   : > { %s1232_s29 = smul.u32 12, %s1228_s28  ;;  %s467_s19 = scalar_lea.vmem %s1359_s6, %s1228_s28 }
  0x21   : > { %s451_s21 = scalar_lea.vmem %s1376_s2, %s1228_s28  ;;  %s860_s17 = sshll.u32 %s1247_s14, 2  ;;  %v972_v33 = vld [vmem:[%s467_s19] ss:$0 sm:$0xff] }
  0x22   : > { %s448_s26 = scalar_lea.vmem %s1377_s1, %s1232_s29  ;;  %s443_s18 = scalar_lea.vmem %s1353_s0, %s860_s17  ;;  %v969_v11 = vld [vmem:[%s451_s21] ss:$0 sm:$0xff] }
  0x23   : > { %s456_s15 = scalar_lea.vmem %s1378_s3, %s1232_s29  ;;  %v475_v0 = vld [vmem:[%s448_s26 + $0x8] sm:$0xf]  ;;  %v889_v8 = vld [vmem:[%s448_s26] sm:$0xff]  ;;  %s459_s1 = scalar_lea.vmem %s1357_s4, %s1228_s28 }
  0x24   : > { %v512_v1 = vld [vmem:[%s456_s15 + $0x8] sm:$0xf]  ;;  %v485_v2 = vunpack.c.l.b16 %v475_v0  ;;  %v890_v9 = vld [vmem:[%s456_s15] sm:$0xff]  ;;  %s470_s15 = scalar_lea.vmem %s1360_s7, %s1247_s14  ;;  %s1274_s14 = sand.u32 1, %s1079_s10  }
  0x25   : > { %v522_v3 = vunpack.c.l.b16 %v512_v1  ;;  %v472_v10 = vld [vmem:[%s443_s18] sm:$0xf]  ;;  %s858_s21 = sshll.u32 %s1274_s14, 3  ;;  %s883_s28 = sshll.u32 %s1091_s13, 1 }
  0x26   : > { %v487_v4 = vpack.c.b16 %v485_v2, %v485_v2  ;;  %v970_v12 = vld [vmem:[%s459_s1] ss:$0 sm:$0xff]  ;;  %s464_s1 = scalar_lea.vmem %s1358_s5, %s1232_s29  ;;  %s1280_s29 = scalar_lea.vmem [#allocation4], %s858_s21 }
  0x27   : > { %v524_v5 = vpack.c.b16 %v522_v3, %v522_v3  ;;  %v544_v23 = vld [vmem:[%s464_s1 + $0x8] sm:$0xf]  ;;  %v891_v27 = vld [vmem:[%s464_s1] sm:$0xff]  ;;  %s651_s20 = sadd.s32 %s1087_s12, %s883_s28  ;;  %s671_s2 = sshll.u32 %s1280_s29, 4  ;;  %s672_s2 = int_to_ptr.vmem [resolvable:$true] %s671_s2 }
  0x28   : > { %v495_v6 = vsel %vm493_vm0, %v487_v4, 0  ;;  %v554_v24 = vunpack.c.l.b16 %v544_v23  ;;  %v971_v28 = vld [vmem:[%s470_s15] ss:$0 sm:$0xff]  ;;  %s884_s18 = sshll.u32 %s651_s20, 3  ;;  %s641_s1 = scalar_lea.sflag [#allocation5], %s1274_s14 }
  0x29   : > { %v527_v7 = vsel %vm493_vm0, %v524_v5, 0  ;;  %503 = vmatpush.bf16.msra.mxu0 %v495_v6  ;;  %s669_s15 = scalar_lea.hbm %s1362_s9, %s884_s18  ;;  %s997_s12 = scalar_lea.hbm %s1362_s9, 32 }
  0x2a   : > { %535 = vmatpush.bf16.msra.mxu1 %v527_v7  ;;  %v556_v25 = vpack.c.b16 %v554_v24, %v554_v24  ;;  %s673_s3 = sshll.u32 %s669_s15, 4  ;;  %s674_s3 = int_to_ptr.hbm [resolvable:$true] %s673_s3 }
  0x2b   : > { %s991_s26 = sshra.s32 %s674_s3, 4  ;;  %s992_s26 = int_to_ptr.hbm [resolvable:$true] %s991_s26 }
  0x2c   : > { %v559_v26 = vsel %vm493_vm0, %v556_v25, 0  ;;  %s993_s17 = scalar_lea.hbm %s992_s26, 8  ;;  %p998_p4 = scmp.lt.s32.totalorder %s992_s26, %s1362_s9 }
  0x2d   : > { %504 = vmatpush.bf16.msra.mxu0 %v889_v8  ;;  %567 = vmatpush.bf16.msra.mxu2 %v559_v26  ;;  %p994_p0 = scmp.ne.s32.totalorder %s992_s26, %s993_s17  ;;  %p999_p5 = scmp.lt.s32.totalorder %s997_s12, %s993_s17 }
  0x2e   : > { %536 = vmatpush.bf16.msra.mxu1 %v890_v9 }
  0x2f   : > { %p995_p1 = pnand %p994_p0, %p1206_p3  ;;  %p1000_p6 = por %p999_p5, %p998_p4 }
  0x30   : > { %868 = vmatmul.msk.bf16.vlgmr.msra.gmra.mxu0 %vm489_vm1, %v472_v10 }
  0x31   : > { %873 = vmatmul.msk.bf16.vlgmr.msra.gmra.mxu1 %vm489_vm1, %v472_v10  ;;  %568 = vmatpush.bf16.msra.mxu2 %v891_v27  ;;  %p996_p2 = pneg %p995_p1 }
  0x33   : > { %p1001_p7 = pnand %p1000_p6, %p996_p2 }
  0x34   : > { %878 = vmatmul.msk.bf16.vlgmr.msra.gmra.mxu2 %vm489_vm1, %v472_v10 }
  0xad   : > { %v506_v13 = vpop.f32.mrf.mxu0 }
  0xae   : > { %v538_v14 = vpop.f32.mrf.mxu1  ;;  %v507_v15 = vadd.f32 %v969_v11, %v506_v13 }
  0xaf   : > { %v539_v16 = vadd.f32 %v970_v12, %v538_v14 }
  0xb0   : > { %v574_v18 = vmul.f32 0.35355338, %v507_v15 }
  0xb1   : > { %v576_v17 = vpack.c.bf16 %v539_v16, %v539_v16 }
  0xb2   : > { %v575_v22 = vpack.c.bf16 %v574_v18, %v574_v18 }
  0xb3   : > { %v586_v19 = vsel %vm581_vm2, %v576_v17, 0 }
  0xb4   : > { %595 = vmatpush.bf16.xpose.msra.mxu3 %v586_v19 }
  0xb5   : > { %v508_v20 = vpop.f32.mrf.mxu0 }
  0xb6   : > { %v540_v21 = vpop.f32.mrf.mxu1 }
  0xb7   : > { %v570_v36 = vpop.f32.mrf.mxu2 }
  0xb8   : > { %v571_v37 = vadd.f32 %v972_v33, %v570_v36 }
  0xba   : > { %v614_v39 = vpack.c.bf16 %v571_v37, %v571_v37 }
  0xbb   : > { %879 = vmatmul.msk.bf16.vlgmr.msra.gmra.mxu3 %vm581_vm2, %v575_v22 }
  0xbc   : > { %v619_v40 = vsel %vm493_vm0, %v614_v39, 0 }
  0xbd   : > { %628 = vmatpush.bf16.msrb.mxu0 %v619_v40 }
  0xbf   : > { %v572_v41 = vpop.f32.mrf.mxu2 }
 0x13e   : > { %v597_v29 = vpop.f32.mrf.mxu3 }
 0x13f   : > { %v598_v30 = vadd.f32 %v971_v28, %v597_v29 }
 0x141   : > { %v602_v31 = vsel %vm581_vm2, %v598_v30, -inf  ;;  %601 = vst.msk [vmem:[%s1280_s29] sm:$0xff] %vm581_vm2, %v598_v30 }
 0x142   : > { %603 = vmax.xlane.f32.xlu0 %v602_v31 }
 0x146   : > { %v599_v32 = vpop.f32.mrf.mxu3 }
 0x1b5   : > { %v604_v34 = vpop.xlane.xlu0 %603 }
 0x1b6   : > { %v605_v35 = vsub.f32 %v598_v30, %v604_v34 }
 0x1b8   : > { %v606_v38 = vmul.f32 1.442695, %v605_v35 }
 0x1ba   : > { %973 = vpow2.f32 %v606_v38 }
 0x1c0   : > { %v974_v42 = vpop.eup %973 }
 0x1c1   : > { %v608_v43 = vsel %vm581_vm2, %v974_v42, 0.0 }
 0x1c2   : > { %609 = vadd.xlane.f32.xlu0 %v608_v43 }
 0x235   : > { %v610_v44 = vpop.xlane.xlu0 %609 }
 0x236   : > { %975 = vrcp.f32 %v610_v44 }
 0x23c   : > { %v976_v45 = vpop.eup %975 }
 0x23d   : > { %v612_v46 = vmul.f32 %v976_v45, %v974_v42 }
 0x23f   : > { %v613_v47 = vpack.c.bf16 %v612_v46, %v612_v46 }
 0x241   : > { %880 = vmatmul.msk.bf16.vlgmr.msrb.gmra.mxu0 %vm581_vm2, %v613_v47 }
 0x242   : > { %1004 = shalt.err (!%p1001_p7)
}
 0x243   : > { %894 = dma.vmem_to_hbm [thread:$0]  (%p1206_p3), %s672_s2, 128, %s674_s3, %s641_s1  }
 0x244   : > { %s653_s25 = scalar_lea.hbm %s1361_s8, %s884_s18  ;;  %s432_s15 = scalar_lea.vmem [#allocation2], %s858_s21 }
 0x245   : > { %s655_s13 = sshll.u32 %s432_s15, 4  ;;  %s657_s19 = sshll.u32 %s653_s25, 4  ;;  %s656_s13 = int_to_ptr.vmem [resolvable:$true] %s655_s13  ;;  %s658_s19 = int_to_ptr.hbm [resolvable:$true] %s657_s19 }
 0x246   : > { %s636_s26 = scalar_lea.sflag [#allocation3], %s1274_s14  ;;  %s1019_s17 = sshra.s32 %s658_s19, 4  ;;  %s1020_s17 = int_to_ptr.hbm [resolvable:$true] %s1019_s17 }
 0x247   : > { %s1021_s12 = scalar_lea.hbm %s1020_s17, 8  ;;  %s1025_s18 = scalar_lea.hbm %s1361_s8, 32 }
 0x248   : > { %p1022_p9 = scmp.ne.s32.totalorder %s1020_s17, %s1021_s12  ;;  %p1026_p12 = scmp.lt.s32.totalorder %s1020_s17, %s1361_s8 }
 0x249   : > { %p1027_p13 = scmp.lt.s32.totalorder %s1025_s18, %s1021_s12 }
 0x24a   : > { %p1023_p10 = pnand %p1022_p9, %p1206_p3 }
 0x24b   : > { %p1028_p0 = por %p1027_p13, %p1026_p12 }
 0x24c   : > { %p1024_p11 = pneg %p1023_p10 }
 0x24e   : > { %p1029_p1 = pnand %p1028_p0, %p1024_p11 }
 0x2be   : > { %v630_v48 = vpop.f32.mrf.mxu0 }
 0x2bf   : > { %634 = vst.msk [vmem:[%s432_s15] sm:$0xff] %vm581_vm2, %v630_v48 }
 0x2c0   : > { %1032 = shalt.err (!%p1029_p1)
}
 0x2c1   : > { %893 = dma.vmem_to_hbm [thread:$0]  (%p1206_p3), %s656_s13, 128, %s658_s19, %s636_s26  }
 0x2c6   : > { %v632_v49 = vpop.f32.mrf.mxu0 }
 0x2c7 PF: > { %p904_p2 = scmp.ge.s32.totalorder %s1103_s16, 2  ;;  %s685_s14 = sand.u32 1, %s1075_s30  }
 0x2c8   : > { %s686_s28 = scalar_lea.sflag [#allocation3], %s685_s14 }
 0x2c9   : > { %p898_p4 = pnand %p904_p2, %p1215_p8 }
 0x2cb   : > { %p899_p5 = pneg %p898_p4 }
 0x2cd   : > { %1066 = dma.done.wait (%p899_p5), %s686_s28, 128  }
 0x2ce   : > { %1068 = vsyncadd (%p899_p5), %s686_s28, 4294967168  ;;  %s696_s20 = scalar_lea.sflag [#allocation5], %s685_s14 }
 0x2cf   : > { %1070 = dma.done.wait (%p899_p5), %s696_s20, 128  }
 0x2d0   : > { %1072 = vsyncadd (%p899_p5), %s696_s20, 4294967168  ;;  %s26_s16 = sadd.s32 1, %s1103_s16   ;;  %s1379_s12 = sld [smem:[#allocation8_spill]] }
 0x2d1   : > { %p23_p6 = scmp.ge.s32.totalorder %s26_s16, 6   ;;  %s1380_s13 = sld [smem:[#allocation9_spill]] }
 0x2d2   : > { %s1381_s14 = sld [smem:[#allocation10_spill]]  ;;  %s1383_s30 = smov %s1079_s10 }
 0x2d3   : > { %s1382_s15 = sld [smem:[#allocation11_spill]]  ;;  %s1384_s10 = smov %s1083_s11 }
 0x2d4   : > { %s1385_s11 = smov %s1224_s27  ;;  %25 = sbr.rel (!%p23_p6) target bundleno = 11 (0xb), region = 125 }
 0x2d9   :  { %702 = vsyncpa [#allocation3], 1 }
 0x2da   :  { %704 = vsyncpa [#allocation3 + $0x1], 1 }
 0x2db   :  { %705 = vsyncpa [#allocation5], 1 }
 0x2dc   :  { %707 = vsyncpa [#allocation5 + $0x1], 1 }

</bundles_post_ra>
